<compile_context>
chip_gen: v5e
topology: v5e:2x2
jax: 0.10.0
libtpu: 0.0.40
codegen_flags: <defaults>
</compile_context>

<pallas_src>
import math
import functools

import jax
import jax.numpy as jnp
from jax import lax
from jax.experimental import pallas as pl
from jax.experimental.pallas import tpu as pltpu


def _round_up(x, m):
    return (x + m - 1) // m * m


def encoder_layer_kernel(x_ref,
                         wsa_ref, bsa_ref,
                         g1_ref, be1_ref,
                         w1_ref, b1_ref, w2_ref, b2_ref,
                         g2_ref, be2_ref,
                         o_ref, *, eps, inv_c):
    x = x_ref[...].astype(jnp.float32)                       # (block_m, Cp)

    # ---- attention path (identity mask => out_proj(v); Wv*Wo pre-folded) ----
    sa = jnp.dot(x.astype(jnp.bfloat16), wsa_ref[...],
                 preferred_element_type=jnp.float32) + bsa_ref[...]

    # ---- residual + LayerNorm1 (one-pass stats, true-C denominator) ---------
    h = x + sa                                               # padded lanes == 0
    mu = jnp.sum(h, axis=-1, keepdims=True) * inv_c
    var = jnp.maximum(jnp.sum(h * h, axis=-1, keepdims=True) * inv_c - mu * mu, 0.0)
    h = (h - mu) * lax.rsqrt(var + eps) * g1_ref[...] + be1_ref[...]

    # ---- feed-forward (ReLU) -------------------------------------------------
    ff = jnp.dot(h.astype(jnp.bfloat16), w1_ref[...],
                 preferred_element_type=jnp.float32) + b1_ref[...]
    ff = jnp.maximum(ff, 0.0)
    ff = jnp.dot(ff.astype(jnp.bfloat16), w2_ref[...],
                 preferred_element_type=jnp.float32) + b2_ref[...]

    # ---- residual + LayerNorm2 -----------------------------------------------
    h2 = h + ff
    mu2 = jnp.sum(h2, axis=-1, keepdims=True) * inv_c
    var2 = jnp.maximum(jnp.sum(h2 * h2, axis=-1, keepdims=True) * inv_c - mu2 * mu2, 0.0)
    out = (h2 - mu2) * lax.rsqrt(var2 + eps) * g2_ref[...] + be2_ref[...]

    o_ref[...] = out.astype(o_ref.dtype)


def local_sa_encoder_layer(src, params, *, eps=1e-5, block_m=512):
    """src: (B, N, C) float32. Returns (B, N, C)."""
    B, N, C = src.shape
    FF = params["w1"].shape[0]
    M = B * N

    # Lane-dense padding: last dims padded to multiples of 128 so stores are
    # unmasked and the MXU K/N dims are fully used. Padded lanes of every
    # weight/bias/gamma/beta are zero, so padded activation lanes stay exactly
    # zero through the whole layer and the LN sums over the padded axis are
    # identical to sums over the true C lanes.
    Cp = _round_up(C, 128)
    FFp = _round_up(FF, 128)

    # Row blocking: batch folds into the matmul M dimension.
    block_m = max(8, min(block_m, _round_up(M, 8)))
    if _round_up(M, block_m) // block_m < 2 and M > 8:
        # Guarantee >=2 row blocks so both v7x TensorCores get work.
        block_m = _round_up((M + 1) // 2, 8)
    M_pad = _round_up(M, block_m)
    n_blocks = M_pad // block_m

    x2d = src.reshape(M, C)
    x2d = jnp.pad(x2d, ((0, M_pad - M), (0, Cp - C)))   # zero rows/lanes

    def pad2(a, r, c):
        return jnp.pad(a, ((0, r - a.shape[0]), (0, c - a.shape[1])))

    f32, bf16 = jnp.float32, jnp.bfloat16

    # Fold the two attention-path matmuls (exact: identity mask => attn@v == v).
    w_sa = params["wv"].T.astype(f32) @ params["wo"].T.astype(f32)    # (C, C)
    b_sa = params["bv"] @ params["wo"].T + params["bo"]               # (1, C)

    # Pre-transposed, zero-padded, bf16 weights (MXU); biases/LN params f32.
    ordered = (
        pad2(w_sa, Cp, Cp).astype(bf16),
        pad2(b_sa, 1, Cp),
        pad2(params["g1"], 1, Cp),
        pad2(params["be1"], 1, Cp),
        pad2(params["w1"].T, Cp, FFp).astype(bf16),
        pad2(params["b1"], 1, FFp),
        pad2(params["w2"].T, FFp, Cp).astype(bf16),
        pad2(params["b2"], 1, Cp),
        pad2(params["g2"], 1, Cp),
        pad2(params["be2"], 1, Cp),
    )

    def full_spec(p):
        # Constant-index weight blocks, resident across the whole grid.
        return pl.BlockSpec(p.shape, lambda i: (0, 0))

    in_specs = ([pl.BlockSpec((block_m, Cp), lambda i: (i, 0))]
                + [full_spec(p) for p in ordered])
    out_spec = pl.BlockSpec((block_m, Cp), lambda i: (i, 0))

    kernel = functools.partial(encoder_layer_kernel, eps=eps, inv_c=1.0 / C)

    out = pl.pallas_call(
        kernel,
        out_shape=jax.ShapeDtypeStruct((M_pad, Cp), src.dtype),
        grid_spec=pltpu.PrefetchScalarGridSpec(
            num_scalar_prefetch=0,
            grid=(n_blocks,),
            in_specs=in_specs,
            out_specs=out_spec,
        ),
        compiler_params=pltpu.CompilerParams(
            dimension_semantics=("parallel",)),
    )(x2d, *ordered)

    return out[:M, :C].reshape(B, N, C)


def reference(src, params, *, eps=1e-5):
    """Pure-JAX f32 reference with the FULL (q/k/scores/mask/softmax) path."""
    B, N, C = src.shape
    scale = math.sqrt(C)   # module MULTIPLIES by sqrt(embed_dim)
    x = src.astype(jnp.float32)
    q = x @ params["wq"].T + params["bq"]
    k = x @ params["wk"].T + params["bk"]
    v = x @ params["wv"].T + params["bv"]
    scores = jnp.einsum("bnc,bmc->bnm", q, k) * scale
    eye = jnp.eye(N, dtype=bool)
    scores = jnp.where(eye[None], scores, -jnp.inf)
    attn = jax.nn.softmax(scores, axis=-1)
    sa = jnp.einsum("bnm,bmc->bnc", attn, v)
    sa = sa @ params["wo"].T + params["bo"]

    def ln(h, g, b):
        mu = jnp.mean(h, axis=-1, keepdims=True)
        var = jnp.mean((h - mu) ** 2, axis=-1, keepdims=True)
        return (h - mu) * lax.rsqrt(var + eps) * g + b

    h = ln(x + sa, params["g1"], params["be1"])
    ff = jnp.maximum(h @ params["w1"].T + params["b1"], 0.0)
    ff = ff @ params["w2"].T + params["b2"]
    return ln(h + ff, params["g2"], params["be2"])


def make_params(key, d_model, dim_feedforward):
    ks = jax.random.split(key, 8)
    s = 0.05
    return {
        # qkv_proj (Linear(d_model, 3*d_model)) split into q/k/v pieces
        "wq": jax.random.normal(ks[0], (d_model, d_model), jnp.float32) * s,
        "wk": jax.random.normal(ks[1], (d_model, d_model), jnp.float32) * s,
        "wv": jax.random.normal(ks[2], (d_model, d_model), jnp.float32) * s,
        "bq": jax.random.normal(ks[3], (1, d_model), jnp.float32) * s,
        "bk": jax.random.normal(ks[4], (1, d_model), jnp.float32) * s,
        "bv": jax.random.normal(ks[5], (1, d_model), jnp.float32) * s,
        # out_proj
        "wo": jax.random.normal(ks[6], (d_model, d_model), jnp.float32) * s,
        "bo": jnp.zeros((1, d_model), jnp.float32),
        # LayerNorm1 / LayerNorm2
        "g1": jnp.ones((1, d_model), jnp.float32),
        "be1": jnp.zeros((1, d_model), jnp.float32),
        "g2": jnp.ones((1, d_model), jnp.float32),
        "be2": jnp.zeros((1, d_model), jnp.float32),
        # feed-forward: linear1 (FF, C), linear2 (C, FF)
        "w1": jax.random.normal(ks[7], (dim_feedforward, d_model), jnp.float32) * s,
        "b1": jnp.zeros((1, dim_feedforward), jnp.float32),
        "w2": jax.random.normal(jax.random.fold_in(key, 99),
                                (d_model, dim_feedforward), jnp.float32) * s,
        "b2": jnp.zeros((1, d_model), jnp.float32),
    }


if __name__ == "__main__":
    B, N = 2, 8            # window_size == sequence length == 8
    d_model = 32
    nhead = 4              # unused by LocalSelfAttention (kept for module signature)
    dim_feedforward = 64

    key = jax.random.PRNGKey(0)
    k_x, k_p = jax.random.split(key)
    src = jax.random.normal(k_x, (B, N, d_model), jnp.float32)
    params = make_params(k_p, d_model, dim_feedforward)

    out = local_sa_encoder_layer(src, params)
    out = jax.block_until_ready(out)

    ref = reference(src, params)
    assert out.shape == (B, N, d_model)
    # bf16 MXU operands -> tolerance at bf16-rounding level vs. the f32 reference.
    assert bool(jnp.allclose(out, ref, atol=2e-2, rtol=2e-2)), "mismatch vs JAX reference"

    print("KERNEL_OK")
</pallas_src>

<mosaic_0001>
module attributes {stable_mosaic.version = 11 : i64} {
  func.func @encoder_layer_kernel(%arg0: i32, %arg1: memref<8x128xf32, #tpu.memory_space<vmem>>, %arg2: memref<128x128xbf16, #tpu.memory_space<vmem>>, %arg3: memref<1x128xf32, #tpu.memory_space<vmem>>, %arg4: memref<1x128xf32, #tpu.memory_space<vmem>>, %arg5: memref<1x128xf32, #tpu.memory_space<vmem>>, %arg6: memref<128x128xbf16, #tpu.memory_space<vmem>>, %arg7: memref<1x128xf32, #tpu.memory_space<vmem>>, %arg8: memref<128x128xbf16, #tpu.memory_space<vmem>>, %arg9: memref<1x128xf32, #tpu.memory_space<vmem>>, %arg10: memref<1x128xf32, #tpu.memory_space<vmem>>, %arg11: memref<1x128xf32, #tpu.memory_space<vmem>>, %arg12: memref<8x128xf32, #tpu.memory_space<vmem>>) attributes {dimension_semantics = [#tpu.dimension_semantics<parallel>], iteration_bounds = array<i64: 2>, scalar_prefetch = 0 : i64, scratch_operands = 0 : i64, tpu.core_type = #tpu.core_type<tc>, window_params = [{transform_indices = @transform_0, window_bounds = array<i64: 8, 128>}, {pipeline_mode = #tpu.pipeline_mode<synchronous>, transform_indices = @transform_1, window_bounds = array<i64: 128, 128>}, {pipeline_mode = #tpu.pipeline_mode<synchronous>, transform_indices = @transform_2, window_bounds = array<i64: 1, 128>}, {pipeline_mode = #tpu.pipeline_mode<synchronous>, transform_indices = @transform_3, window_bounds = array<i64: 1, 128>}, {pipeline_mode = #tpu.pipeline_mode<synchronous>, transform_indices = @transform_4, window_bounds = array<i64: 1, 128>}, {pipeline_mode = #tpu.pipeline_mode<synchronous>, transform_indices = @transform_5, window_bounds = array<i64: 128, 128>}, {pipeline_mode = #tpu.pipeline_mode<synchronous>, transform_indices = @transform_6, window_bounds = array<i64: 1, 128>}, {pipeline_mode = #tpu.pipeline_mode<synchronous>, transform_indices = @transform_7, window_bounds = array<i64: 128, 128>}, {pipeline_mode = #tpu.pipeline_mode<synchronous>, transform_indices = @transform_8, window_bounds = array<i64: 1, 128>}, {pipeline_mode = #tpu.pipeline_mode<synchronous>, transform_indices = @transform_9, window_bounds = array<i64: 1, 128>}, {pipeline_mode = #tpu.pipeline_mode<synchronous>, transform_indices = @transform_10, window_bounds = array<i64: 1, 128>}, {transform_indices = @transform_11, window_bounds = array<i64: 8, 128>}]} {
    %c0 = arith.constant 0 : index
    %c0_0 = arith.constant 0 : index
    %0 = vector.load %arg1[%c0, %c0_0] : memref<8x128xf32, #tpu.memory_space<vmem>>, vector<8x128xf32>
    %1 = arith.truncf %0 : vector<8x128xf32> to vector<8x128xbf16>
    %c0_1 = arith.constant 0 : index
    %c0_2 = arith.constant 0 : index
    %2 = vector.load %arg2[%c0_1, %c0_2] : memref<128x128xbf16, #tpu.memory_space<vmem>>, vector<128x128xbf16>
    %cst = arith.constant dense<0.000000e+00> : vector<8x128xf32>
    %3 = tpu.matmul %1, %2, %cst {dimension_numbers = #tpu.dot_dimension_numbers<[1], [0], [0], [1], [0, 0, 1, 1], [], []>} : vector<8x128xbf16>, vector<128x128xbf16>, vector<8x128xf32> -> vector<8x128xf32>
    %c0_3 = arith.constant 0 : index
    %c0_4 = arith.constant 0 : index
    %4 = vector.load %arg3[%c0_3, %c0_4] : memref<1x128xf32, #tpu.memory_space<vmem>>, vector<1x128xf32>
    %5 = vector.broadcast %4 : vector<1x128xf32> to vector<8x128xf32>
    %6 = arith.addf %3, %5 : vector<8x128xf32>
    %7 = arith.addf %0, %6 : vector<8x128xf32>
    %cst_5 = arith.constant dense<0.000000e+00> : vector<8xf32>
    %8 = vector.multi_reduction <add>, %7, %cst_5 [1] : vector<8x128xf32> to vector<8xf32>
    %9 = vector.shape_cast %8 : vector<8xf32> to vector<8x1xf32>
    %cst_6 = arith.constant 3.125000e-02 : f32
    %10 = vector.broadcast %cst_6 : f32 to vector<8x1xf32>
    %11 = arith.mulf %9, %10 : vector<8x1xf32>
    %12 = arith.mulf %7, %7 : vector<8x128xf32>
    %cst_7 = arith.constant dense<0.000000e+00> : vector<8xf32>
    %13 = vector.multi_reduction <add>, %12, %cst_7 [1] : vector<8x128xf32> to vector<8xf32>
    %14 = vector.shape_cast %13 : vector<8xf32> to vector<8x1xf32>
    %cst_8 = arith.constant 3.125000e-02 : f32
    %15 = vector.broadcast %cst_8 : f32 to vector<8x1xf32>
    %16 = arith.mulf %14, %15 : vector<8x1xf32>
    %17 = arith.mulf %11, %11 : vector<8x1xf32>
    %18 = arith.subf %16, %17 : vector<8x1xf32>
    %cst_9 = arith.constant 0.000000e+00 : f32
    %19 = vector.broadcast %cst_9 : f32 to vector<8x1xf32>
    %20 = arith.maximumf %18, %19 : vector<8x1xf32>
    %21 = vector.broadcast %11 : vector<8x1xf32> to vector<8x128xf32>
    %22 = arith.subf %7, %21 : vector<8x128xf32>
    %cst_10 = arith.constant 9.99999974E-6 : f32
    %23 = vector.broadcast %cst_10 : f32 to vector<8x1xf32>
    %24 = arith.addf %20, %23 : vector<8x1xf32>
    %25 = math.rsqrt %24 : vector<8x1xf32>
    %26 = vector.broadcast %25 : vector<8x1xf32> to vector<8x128xf32>
    %27 = arith.mulf %22, %26 : vector<8x128xf32>
    %c0_11 = arith.constant 0 : index
    %c0_12 = arith.constant 0 : index
    %28 = vector.load %arg4[%c0_11, %c0_12] : memref<1x128xf32, #tpu.memory_space<vmem>>, vector<1x128xf32>
    %29 = vector.broadcast %28 : vector<1x128xf32> to vector<8x128xf32>
    %30 = arith.mulf %27, %29 : vector<8x128xf32>
    %c0_13 = arith.constant 0 : index
    %c0_14 = arith.constant 0 : index
    %31 = vector.load %arg5[%c0_13, %c0_14] : memref<1x128xf32, #tpu.memory_space<vmem>>, vector<1x128xf32>
    %32 = vector.broadcast %31 : vector<1x128xf32> to vector<8x128xf32>
    %33 = arith.addf %30, %32 : vector<8x128xf32>
    %34 = arith.truncf %33 : vector<8x128xf32> to vector<8x128xbf16>
    %c0_15 = arith.constant 0 : index
    %c0_16 = arith.constant 0 : index
    %35 = vector.load %arg6[%c0_15, %c0_16] : memref<128x128xbf16, #tpu.memory_space<vmem>>, vector<128x128xbf16>
    %cst_17 = arith.constant dense<0.000000e+00> : vector<8x128xf32>
    %36 = tpu.matmul %34, %35, %cst_17 {dimension_numbers = #tpu.dot_dimension_numbers<[1], [0], [0], [1], [0, 0, 1, 1], [], []>} : vector<8x128xbf16>, vector<128x128xbf16>, vector<8x128xf32> -> vector<8x128xf32>
    %c0_18 = arith.constant 0 : index
    %c0_19 = arith.constant 0 : index
    %37 = vector.load %arg7[%c0_18, %c0_19] : memref<1x128xf32, #tpu.memory_space<vmem>>, vector<1x128xf32>
    %38 = vector.broadcast %37 : vector<1x128xf32> to vector<8x128xf32>
    %39 = arith.addf %36, %38 : vector<8x128xf32>
    %cst_20 = arith.constant 0.000000e+00 : f32
    %40 = vector.broadcast %cst_20 : f32 to vector<8x128xf32>
    %41 = arith.maximumf %39, %40 : vector<8x128xf32>
    %42 = arith.truncf %41 : vector<8x128xf32> to vector<8x128xbf16>
    %c0_21 = arith.constant 0 : index
    %c0_22 = arith.constant 0 : index
    %43 = vector.load %arg8[%c0_21, %c0_22] : memref<128x128xbf16, #tpu.memory_space<vmem>>, vector<128x128xbf16>
    %cst_23 = arith.constant dense<0.000000e+00> : vector<8x128xf32>
    %44 = tpu.matmul %42, %43, %cst_23 {dimension_numbers = #tpu.dot_dimension_numbers<[1], [0], [0], [1], [0, 0, 1, 1], [], []>} : vector<8x128xbf16>, vector<128x128xbf16>, vector<8x128xf32> -> vector<8x128xf32>
    %c0_24 = arith.constant 0 : index
    %c0_25 = arith.constant 0 : index
    %45 = vector.load %arg9[%c0_24, %c0_25] : memref<1x128xf32, #tpu.memory_space<vmem>>, vector<1x128xf32>
    %46 = vector.broadcast %45 : vector<1x128xf32> to vector<8x128xf32>
    %47 = arith.addf %44, %46 : vector<8x128xf32>
    %48 = arith.addf %33, %47 : vector<8x128xf32>
    %cst_26 = arith.constant dense<0.000000e+00> : vector<8xf32>
    %49 = vector.multi_reduction <add>, %48, %cst_26 [1] : vector<8x128xf32> to vector<8xf32>
    %50 = vector.shape_cast %49 : vector<8xf32> to vector<8x1xf32>
    %cst_27 = arith.constant 3.125000e-02 : f32
    %51 = vector.broadcast %cst_27 : f32 to vector<8x1xf32>
    %52 = arith.mulf %50, %51 : vector<8x1xf32>
    %53 = arith.mulf %48, %48 : vector<8x128xf32>
    %cst_28 = arith.constant dense<0.000000e+00> : vector<8xf32>
    %54 = vector.multi_reduction <add>, %53, %cst_28 [1] : vector<8x128xf32> to vector<8xf32>
    %55 = vector.shape_cast %54 : vector<8xf32> to vector<8x1xf32>
    %cst_29 = arith.constant 3.125000e-02 : f32
    %56 = vector.broadcast %cst_29 : f32 to vector<8x1xf32>
    %57 = arith.mulf %55, %56 : vector<8x1xf32>
    %58 = arith.mulf %52, %52 : vector<8x1xf32>
    %59 = arith.subf %57, %58 : vector<8x1xf32>
    %cst_30 = arith.constant 0.000000e+00 : f32
    %60 = vector.broadcast %cst_30 : f32 to vector<8x1xf32>
    %61 = arith.maximumf %59, %60 : vector<8x1xf32>
    %62 = vector.broadcast %52 : vector<8x1xf32> to vector<8x128xf32>
    %63 = arith.subf %48, %62 : vector<8x128xf32>
    %cst_31 = arith.constant 9.99999974E-6 : f32
    %64 = vector.broadcast %cst_31 : f32 to vector<8x1xf32>
    %65 = arith.addf %61, %64 : vector<8x1xf32>
    %66 = math.rsqrt %65 : vector<8x1xf32>
    %67 = vector.broadcast %66 : vector<8x1xf32> to vector<8x128xf32>
    %68 = arith.mulf %63, %67 : vector<8x128xf32>
    %c0_32 = arith.constant 0 : index
    %c0_33 = arith.constant 0 : index
    %69 = vector.load %arg10[%c0_32, %c0_33] : memref<1x128xf32, #tpu.memory_space<vmem>>, vector<1x128xf32>
    %70 = vector.broadcast %69 : vector<1x128xf32> to vector<8x128xf32>
    %71 = arith.mulf %68, %70 : vector<8x128xf32>
    %c0_34 = arith.constant 0 : index
    %c0_35 = arith.constant 0 : index
    %72 = vector.load %arg11[%c0_34, %c0_35] : memref<1x128xf32, #tpu.memory_space<vmem>>, vector<1x128xf32>
    %73 = vector.broadcast %72 : vector<1x128xf32> to vector<8x128xf32>
    %74 = arith.addf %71, %73 : vector<8x128xf32>
    %c0_36 = arith.constant 0 : index
    %c0_37 = arith.constant 0 : index
    %75 = vector.load %arg12[%c0_36, %c0_37] : memref<8x128xf32, #tpu.memory_space<vmem>>, vector<8x128xf32>
    tpu.vector_store %arg12[%c0_36, %c0_37], %74 {strides = array<i32>} : memref<8x128xf32, #tpu.memory_space<vmem>>, vector<8x128xf32>,
    return
  }
  func.func @transform_0(%arg0: i32) -> (i32, i32) {
    %c0_i32 = arith.constant 0 : i32
    %c0_i32_0 = arith.constant 0 : i32
    return %arg0, %c0_i32 : i32, i32
  }
  func.func @transform_1(%arg0: i32) -> (i32, i32) {
    %c0_i32 = arith.constant 0 : i32
    %c0_i32_0 = arith.constant 0 : i32
    %c0_i32_1 = arith.constant 0 : i32
    return %c0_i32, %c0_i32_0 : i32, i32
  }
  func.func @transform_2(%arg0: i32) -> (i32, i32) {
    %c0_i32 = arith.constant 0 : i32
    %c0_i32_0 = arith.constant 0 : i32
    %c0_i32_1 = arith.constant 0 : i32
    return %c0_i32, %c0_i32_0 : i32, i32
  }
  func.func @transform_3(%arg0: i32) -> (i32, i32) {
    %c0_i32 = arith.constant 0 : i32
    %c0_i32_0 = arith.constant 0 : i32
    %c0_i32_1 = arith.constant 0 : i32
    return %c0_i32, %c0_i32_0 : i32, i32
  }
  func.func @transform_4(%arg0: i32) -> (i32, i32) {
    %c0_i32 = arith.constant 0 : i32
    %c0_i32_0 = arith.constant 0 : i32
    %c0_i32_1 = arith.constant 0 : i32
    return %c0_i32, %c0_i32_0 : i32, i32
  }
  func.func @transform_5(%arg0: i32) -> (i32, i32) {
    %c0_i32 = arith.constant 0 : i32
    %c0_i32_0 = arith.constant 0 : i32
    %c0_i32_1 = arith.constant 0 : i32
    return %c0_i32, %c0_i32_0 : i32, i32
  }
  func.func @transform_6(%arg0: i32) -> (i32, i32) {
    %c0_i32 = arith.constant 0 : i32
    %c0_i32_0 = arith.constant 0 : i32
    %c0_i32_1 = arith.constant 0 : i32
    return %c0_i32, %c0_i32_0 : i32, i32
  }
  func.func @transform_7(%arg0: i32) -> (i32, i32) {
    %c0_i32 = arith.constant 0 : i32
    %c0_i32_0 = arith.constant 0 : i32
    %c0_i32_1 = arith.constant 0 : i32
    return %c0_i32, %c0_i32_0 : i32, i32
  }
  func.func @transform_8(%arg0: i32) -> (i32, i32) {
    %c0_i32 = arith.constant 0 : i32
    %c0_i32_0 = arith.constant 0 : i32
    %c0_i32_1 = arith.constant 0 : i32
    return %c0_i32, %c0_i32_0 : i32, i32
  }
  func.func @transform_9(%arg0: i32) -> (i32, i32) {
    %c0_i32 = arith.constant 0 : i32
    %c0_i32_0 = arith.constant 0 : i32
    %c0_i32_1 = arith.constant 0 : i32
    return %c0_i32, %c0_i32_0 : i32, i32
  }
  func.func @transform_10(%arg0: i32) -> (i32, i32) {
    %c0_i32 = arith.constant 0 : i32
    %c0_i32_0 = arith.constant 0 : i32
    %c0_i32_1 = arith.constant 0 : i32
    return %c0_i32, %c0_i32_0 : i32, i32
  }
  func.func @transform_11(%arg0: i32) -> (i32, i32) {
    %c0_i32 = arith.constant 0 : i32
    %c0_i32_0 = arith.constant 0 : i32
    return %arg0, %c0_i32 : i32, i32
  }
}

</mosaic_0001>

<bundles_post_ra>
// kernel: tpu_custom_call.1
= control target key start
LH: loop header
LB: loop body
LE: loop exit
PB: predicated region body
PF: predicated region fallthrough
CT: control target
= control target key end

     0   :  { %s1556_s0 = inlined_call_operand.hbm [shape: f32[16,128], index: 0, kind: input, shape index: {}]   ;;  %s1557_s1 = inlined_call_operand.hbm [shape: bf16[128,128], index: 1, kind: input, shape index: {}]   ;;  %s1558_s2 = inlined_call_operand.vmem [shape: f32[1,128], index: 2, kind: input, shape index: {}]   ;;  %s1559_s3 = inlined_call_operand.vmem [shape: f32[1,128], index: 3, kind: input, shape index: {}]   ;;  %s1560_s4 = inlined_call_operand.vmem [shape: f32[1,128], index: 4, kind: input, shape index: {}]   ;;  %s1561_s5 = inlined_call_operand.hbm [shape: bf16[128,128], index: 5, kind: input, shape index: {}]   ;;  %s1562_s6 = inlined_call_operand.vmem [shape: f32[1,128], index: 6, kind: input, shape index: {}]   ;;  %s1563_s7 = inlined_call_operand.hbm [shape: bf16[128,128], index: 7, kind: input, shape index: {}]   ;;  %s1564_s8 = inlined_call_operand.vmem [shape: f32[1,128], index: 8, kind: input, shape index: {}]   ;;  %s1565_s9 = inlined_call_operand.vmem [shape: f32[1,128], index: 9, kind: input, shape index: {}]   ;;  %s1566_s10 = inlined_call_operand.vmem [shape: f32[1,128], index: 10, kind: input, shape index: {}]   ;;  %s1567_s11 = inlined_call_operand.hbm [shape: f32[16,128], index: 11, kind: output, shape index: {}]  }
   0x1   :  { %1569 = sst [smem:[#allocation17_spill]] %s1557_s1 }
   0x2   :  { %1570 = sst [smem:[#allocation18_spill]] %s1561_s5 }
   0x3   :  { %1571 = sst [smem:[#allocation19_spill]] %s1563_s7 }
   0x4   :  { %16 = vsyncpa [#allocation3], 0 }
   0x5   :  { %18 = vsyncpa [#allocation3 + $0x1], 0 }
   0x6   :  { %19 = vsyncpa [#allocation6], 0 }
   0x7   :  { %20 = vsyncpa [#allocation9], 0 }
   0x8   :  { %21 = vsyncpa [#allocation4], 0 }
   0x9   :  { %23 = vsyncpa [#allocation4 + $0x1], 0  ;;  %s1375_s17 = smov 0   ;;  %s1377_s18 = smov 0  }
   0xa   :  { %s1379_s19 = smov 0   ;;  %s1381_s20 = smov 0  }
   0xb LB: > { %1572 = sst [smem:[#allocation15_spill]] %s1304_s19  ;;  %s1399_s24 = sadd.s32 4294967295, %s1308_s20   ;;  %s1308_s20 = sphi %s1381_s20, %s1588_s20   ;;  %s1304_s19 = sphi %s1379_s19, %s1585_s19   ;;  %s1300_s18 = sphi %s1377_s18, %s1587_s18   ;;  %s1296_s17 = sphi %s1375_s17, %s1586_s17  }
   0xc   : > { %s1573_s1 = sld [smem:[#allocation17_spill]]  ;;  %p887_p0 = scmp.ge.s32.totalorder %s1308_s20, 1 }
   0xd   : > { %p50_p1 = scmp.eq.s32.totalorder %s1399_s24, 0  ;;  %p296_p2 = scmp.lt.s32.totalorder %s1308_s20, 3 }
   0xe   : > { %s1310_s26 = smov [#allocation5]   ;;  %s1575_s5 = sld [smem:[#allocation18_spill]] }
   0xf   : > { %p1404_p3 = pnand %p887_p0, %p296_p2  ;;  %s309_s27 = sshll.u32 %s1310_s26, 4  ;;  %s310_s27 = int_to_ptr.vmem [resolvable:$true] %s309_s27 }
  0x10   : > { %s1577_s7 = sld [smem:[#allocation19_spill]]  ;;  %s1311_s16 = smov [#allocation7]  }
  0x11   : > { %p1040_p4 = pneg %p1404_p3  ;;  %s332_s21 = sshll.u32 %s1311_s16, 4  ;;  %s333_s21 = int_to_ptr.vmem [resolvable:$true] %s332_s21 }
  0x12   : > { %s307_s23 = sshll.u32 %s1573_s1, 4  ;;  %s1312_s22 = smov 64   ;;  %s308_s23 = int_to_ptr.hbm [resolvable:$true] %s307_s23 }
  0x13   : > { %p1416_p6 = pnand %p1040_p4, %p50_p1  ;;  %s1313_s26 = smov 4  }
  0x14   : > { %s330_s30 = sshll.u32 %s1575_s5, 4  ;;  %s1314_s28 = smov [#allocation8]   ;;  %s331_s30 = int_to_ptr.hbm [resolvable:$true] %s330_s30 }
  0x15   : > { %1043 = dma.hbm_to_vmem [thread:$0]  (!%p1416_p6), %s308_s23, 1024, %s310_s27, [#allocation6], %s1312_s22, %s1312_s22, %s1313_s26  }
  0x16   : > { %s347_s15 = sshll.u32 %s1577_s7, 4  ;;  %s349_s29 = sshll.u32 %s1314_s28, 4  ;;  %s348_s15 = int_to_ptr.hbm [resolvable:$true] %s347_s15  ;;  %s350_s29 = int_to_ptr.vmem [resolvable:$true] %s349_s29 }
  0x17   : > { %1046 = dma.hbm_to_vmem [thread:$0]  (!%p1416_p6), %s331_s30, 1024, %s333_s21, [#allocation6], %s1312_s22, %s1312_s22, %s1313_s26  }
  0x18   : > { %1049 = dma.hbm_to_vmem [thread:$0]  (!%p1416_p6), %s348_s15, 1024, %s350_s29, [#allocation9], %s1312_s22, %s1312_s22, %s1313_s26  }
  0x19   : > { %s886_s13 = sadd.s32 4294967294, %s1308_s20   ;;  %s1431_s14 = sadd.s32 1, %s1308_s20  }
  0x1a   : > { %s36_s16 = sadd.s32 1, %s1304_s19  ;;  %s33_s23 = ssub.s32 %s1308_s20, %s1431_s14 }
  0x1b   : > { %p43_p7 = scmp.ne.s32.totalorder %s1304_s19, %s1300_s18  ;;  %p34_p8 = scmp.eq.s32.totalorder %s33_s23, 0 }
  0x1c   : > { %p44_p9 = scmp.eq.s32.totalorder %s1308_s20, 0  ;;  %p49_p10 = scmp.ne.s32.totalorder %s1300_s18, %s1296_s17 }
  0x1d   : > { %p283_p11 = scmp.eq.s32.totalorder %s1399_s24, 1  ;;  %p289_p0 = scmp.eq.s32.totalorder %s886_s13, 1 }
  0x1e   : > { %s1443_s27 = scalar_select %p34_p8, %s1304_s19, %s36_s16  }
  0x1f   : > { %p1447_p12 = por %p50_p1, %p49_p10  ;;  %p1451_p13 = por %p283_p11, %p43_p7 }
  0x20   : > { %1578 = sst [smem:[#allocation16_spill]] %s1443_s27  ;;  %p45_p2 = por %p44_p9, %p43_p7 }
  0x21   : > { %s372_s15 = sand.u32 1, %s1304_s19   ;;  %p1456_p4 = por %p289_p0, %p49_p10 }
  0x22   : > { %p1061_p6 = scmp.lt.s32.totalorder %s1308_s20, 2  ;;  %s892_s22 = sshll.u32 %s372_s15, 3 }
  0x23   : > { %s893_s26 = sshll.u32 %s1308_s20, 3  ;;  %s376_s1 = scalar_lea.vmem [#allocation2], %s892_s22 }
  0x24   : > { %s380_s16 = scalar_lea.hbm %s1556_s0, %s893_s26  ;;  %s384_s5 = sshll.u32 %s376_s1, 4  ;;  %s385_s5 = int_to_ptr.vmem [resolvable:$true] %s384_s5 }
  0x25   : > { %s382_s23 = sshll.u32 %s380_s16, 4  ;;  %p1465_p8 = pnand %p1061_p6, %p45_p2  ;;  %s383_s23 = int_to_ptr.hbm [resolvable:$true] %s382_s23 }
  0x26   : > { %s373_s7 = scalar_lea.sflag [#allocation3], %s372_s15  ;;  %s1204_s27 = sshra.s32 %s383_s23, 4  ;;  %s1205_s27 = int_to_ptr.hbm [resolvable:$true] %s1204_s27 }
  0x27   : > { %s1206_s19 = scalar_lea.hbm %s1205_s27, 8  ;;  %p1208_p9 = pneg %p1465_p8 }
  0x28   : > { %p1207_p7 = scmp.ne.s32.totalorder %s1205_s27, %s1206_s19  ;;  %s1211_s1 = scalar_lea.hbm %s1556_s0, 16 }
  0x29   : > { %p1212_p0 = scmp.lt.s32.totalorder %s1205_s27, %s1556_s0  ;;  %p1213_p2 = scmp.lt.s32.totalorder %s1211_s1, %s1206_s19 }
  0x2a   : > { %p1209_p10 = pnand %p1208_p9, %p1207_p7 }
  0x2b   : > { %p1214_p6 = por %p1213_p2, %p1212_p0 }
  0x2c   : > { %p1210_p11 = pneg %p1209_p10 }
  0x2e   : > { %p1215_p5 = pnand %p1214_p6, %p1210_p11 }
  0x30   : > { %1218 = shalt.err (!%p1215_p5)
}
  0x31   : > { %1053 = dma.hbm_to_vmem [thread:$0]  (!%p1465_p8), %s383_s23, 128, %s385_s5, %s373_s7  }
  0x32   : > { %393 = sbr.rel (%p1404_p3) target bundleno = 807 (0x327), region = 64  ;;  %s1482_s15 = sand.u32 (!%p1404_p3), 1, %s1300_s18  }
  0x33   : > { %s895_s16 = sshll.u32 (!%p1404_p3), %s1482_s15, 3  ;;  %s396_s26 = scalar_lea.sflag (!%p1404_p3), [#allocation3], %s1482_s15 }
  0x34   : > { %s399_s19 = scalar_lea.vmem (!%p1404_p3), [#allocation2], %s895_s16 }
  0x37   : > { %1279 = dma.done.wait (%p1447_p12), %s396_s26, 128  }
  0x38   : > { %1281 = vsyncadd (%p1447_p12), %s396_s26, 4294967168 }
  0x39   : > { %1283 = dma.done.wait (%p50_p1), [#allocation6], 2048  }
  0x3a   : > { %1285 = vsyncadd (%p50_p1), [#allocation6], 4294965248 }
  0x3b   : > { %1287 = dma.done.wait (%p50_p1), [#allocation9], 1024  }
  0x3c   : > { %1289 = vsyncadd (%p50_p1), [#allocation9], 4294966272  ;;  %v1007_v0 = vld [vmem:[#allocation5 + $0x38] sm:$0xff]  ;;  %v1006_v1 = vld [vmem:[#allocation5 + $0x30] sm:$0xff]  ;;  %s997_s29 = sshll.u32 %s1399_s24, 3  ;;  %s453_s24 = scalar_lea.vmem [#allocation10], %s895_s16 }
  0x3d   : > { %524 = vmatpush.bf16.msra.mxu0 %v1007_v0  ;;  %v1005_v2 = vld [vmem:[#allocation5 + $0x28] sm:$0xff]  ;;  %v1004_v3 = vld [vmem:[#allocation5 + $0x20] sm:$0xff]  ;;  %v1003_v4 = vld [vmem:[#allocation5 + $0x18] sm:$0xff]  ;;  %s782_s25 = scalar_lea.hbm %s1567_s11, %s997_s29  ;;  %s784_s23 = sshll.u32 %s453_s24, 4  ;;  %s785_s23 = int_to_ptr.vmem [resolvable:$true] %s784_s23 }
  0x3e   : > { %v1002_v5 = vld [vmem:[#allocation5 + $0x10] sm:$0xff]  ;;  %v1001_v6 = vld [vmem:[#allocation5 + $0x8] sm:$0xff]  ;;  %v1000_v7 = vld [vmem:[#allocation5] sm:$0xff]  ;;  %s786_s13 = sshll.u32 %s782_s25, 4  ;;  %s772_s28 = scalar_lea.sflag [#allocation4], %s1482_s15  ;;  %s787_s13 = int_to_ptr.hbm [resolvable:$true] %s786_s13 }
  0x3f   : > { %v454_v8 = vld [vmem:[%s399_s19] sm:$0xff]  ;;  %v1013_v18 = vld [vmem:[#allocation7 + $0x28] sm:$0xff]  ;;  %v1012_v19 = vld [vmem:[#allocation7 + $0x20] sm:$0xff]  ;;  %s1248_s1 = sshra.s32 %s787_s13, 4  ;;  %s1254_s19 = scalar_lea.hbm %s1567_s11, 16  ;;  %s1249_s1 = int_to_ptr.hbm [resolvable:$true] %s1248_s1 }
  0x40   : > { %v455_v9 = vpack.c.bf16 %v454_v8, %v454_v8  ;;  %v1103_v10 = vld [vmem:[%s1558_s2] ss:$0 sm:$0xff]  ;;  %v1015_v16 = vld [vmem:[#allocation7 + $0x38] sm:$0xff]  ;;  %v1009_v23 = vld [vmem:[#allocation7 + $0x8] sm:$0xff]  ;;  %s1250_s22 = scalar_lea.hbm %s1249_s1, 8  ;;  %p1255_p12 = scmp.lt.s32.totalorder %s1249_s1, %s1567_s11 }
  0x41   : > { %525 = vmatpush.bf16.msra.mxu0 %v1006_v1  ;;  %640 = vmatpush.bf16.msra.mxu1 %v1015_v16  ;;  %v1014_v17 = vld [vmem:[#allocation7 + $0x30] sm:$0xff]  ;;  %v1011_v20 = vld [vmem:[#allocation7 + $0x18] sm:$0xff]  ;;  %v1008_v24 = vld [vmem:[#allocation7] sm:$0xff]  ;;  %p1251_p1 = scmp.ne.s32.totalorder %s1249_s1, %s1250_s22  ;;  %p1256_p8 = scmp.lt.s32.totalorder %s1254_s19, %s1250_s22 }
  0x42   : > { %v1010_v21 = vld [vmem:[#allocation7 + $0x10] sm:$0xff]  ;;  %v1023_v30 = vld [vmem:[#allocation8 + $0x38] sm:$0xff]  ;;  %v1021_v34 = vld [vmem:[#allocation8 + $0x28] sm:$0xff] }
  0x43   : > { %723 = vmatpush.bf16.msra.mxu2 %v1023_v30  ;;  %v1022_v32 = vld [vmem:[#allocation8 + $0x30] sm:$0xff]  ;;  %v1020_v35 = vld [vmem:[#allocation8 + $0x20] sm:$0xff]  ;;  %v1019_v38 = vld [vmem:[#allocation8 + $0x18] sm:$0xff]  ;;  %p1252_p3 = pnand %p1251_p1, %p1451_p13  ;;  %p1257_p7 = por %p1256_p8, %p1255_p12 }
  0x44   : > { %v1018_v41 = vld [vmem:[#allocation8 + $0x10] sm:$0xff]  ;;  %v1017_v52 = vld [vmem:[#allocation8 + $0x8] sm:$0xff]  ;;  %v1016_v53 = vld [vmem:[#allocation8] sm:$0xff] }
  0x45   : > { %526 = vmatpush.bf16.msra.mxu0 %v1005_v2  ;;  %641 = vmatpush.bf16.msra.mxu1 %v1014_v17  ;;  %v1104_v45 = vld [vmem:[%s1559_s3] ss:$0 sm:$0xff]  ;;  %p1253_p5 = pneg %p1252_p3 }
  0x46   : > { %v1105_v48 = vld [vmem:[%s1560_s4] ss:$0 sm:$0xff] }
  0x47   : > { %724 = vmatpush.bf16.msra.mxu2 %v1022_v32  ;;  %v1106_v54 = vld [vmem:[%s1562_s6] ss:$0 sm:$0xff]  ;;  %p1258_p9 = pnand %p1257_p7, %p1253_p5 }
  0x48   : > { %v1107_v60 = vld [vmem:[%s1564_s8] ss:$0 sm:$0xff] }
  0x49   : > { %527 = vmatpush.bf16.msra.mxu0 %v1004_v3  ;;  %642 = vmatpush.bf16.msra.mxu1 %v1013_v18  ;;  %v1108_v17 = vld [vmem:[%s1565_s9] ss:$0 sm:$0xff] }
  0x4b   : > { %725 = vmatpush.bf16.msra.mxu2 %v1021_v34 }
  0x4d   : > { %528 = vmatpush.bf16.msra.mxu0 %v1003_v4  ;;  %643 = vmatpush.bf16.msra.mxu1 %v1012_v19 }
  0x4f   : > { %726 = vmatpush.bf16.msra.mxu2 %v1020_v35 }
  0x51   : > { %529 = vmatpush.bf16.msra.mxu0 %v1002_v5  ;;  %644 = vmatpush.bf16.msra.mxu1 %v1011_v20  ;;  %v1109_v20 = vld [vmem:[%s1566_s10] ss:$0 sm:$0xff] }
  0x53   : > { %727 = vmatpush.bf16.msra.mxu2 %v1019_v38 }
  0x55   : > { %530 = vmatpush.bf16.msra.mxu0 %v1001_v6  ;;  %645 = vmatpush.bf16.msra.mxu1 %v1010_v21 }
  0x57   : > { %728 = vmatpush.bf16.msra.mxu2 %v1018_v41 }
  0x59   : > { %531 = vmatpush.bf16.msra.mxu0 %v1000_v7  ;;  %646 = vmatpush.bf16.msra.mxu1 %v1009_v23 }
  0x5b   : > { %729 = vmatpush.bf16.msra.mxu2 %v1017_v52 }
  0x5c   : > { %532 = vmatmul.bf16.vlgmr.msra.gmra.mxu0 %v455_v9 }
  0x5d   : > { %647 = vmatpush.bf16.msra.mxu1 %v1008_v24 }
  0x5f   : > { %730 = vmatpush.bf16.msra.mxu2 %v1016_v53 }
  0xd9   : > { %v533_v11 = vpop.f32.mrf.mxu0 }
  0xda   : > { %v534_v12 = vadd.f32 %v1103_v10, %v533_v11 }
  0xdc   : > { %v537_v13 = vadd.f32 %v534_v12, %v454_v8 }
  0xde   : > { %538 = vadd.xlane.f32.xlu0 %v537_v13  ;;  %v541_v15 = vmul.f32 %v537_v13, %v537_v13 }
  0xe1   : > { %v535_v14 = vpop.f32.mrf.mxu0 }
  0xe6   : > { %542 = vadd.xlane.f32.xlu0 %v541_v15 }
 0x151   : > { %v539_v22 = vpop.xlane.xlu0 %538 }
 0x152   : > { %v540_v25 = vmul.f32 0.03125, %v539_v22 }
 0x154   : > { %v545_v27 = vmul.f32 %v540_v25, %v540_v25  ;;  %v548_v44 = vsub.f32 %v537_v13, %v540_v25 }
 0x159   : > { %v543_v26 = vpop.xlane.xlu0 %542 }
 0x15a   : > { %v544_v28 = vmul.f32 0.03125, %v543_v26 }
 0x15c   : > { %v546_v29 = vsub.f32 %v544_v28, %v545_v27 }
 0x15e   : > { %v547_v31 = vmax.f32 %v546_v29, 0.0 }
 0x160   : > { %v549_v33 = vadd.f32 1e-05, %v547_v31 }
 0x162   : > { %1110 = vrsqrt.f32 %v549_v33  ;;  %vm556_vm1 = vweird.f32 %v549_v33 }
 0x168   : > { %v1111_v36 = vpop.eup %1110 }
 0x169   : > { %v551_v37 = vmul.f32 %v1111_v36, %v549_v33  ;;  %vm557_vm0 = vweird.f32 %v1111_v36 }
 0x16a   : > { %vm558_vm2 = vmor %vm556_vm1, %vm557_vm0 }
 0x16b   : > { %v552_v39 = vmul.f32 %v1111_v36, %v551_v37 }
 0x16d   : > { %v553_v40 = vmul.f32 0.5, %v552_v39 }
 0x16f   : > { %v554_v42 = vsub.f32 1.5, %v553_v40 }
 0x171   : > { %v555_v43 = vmul.f32 %v1111_v36, %v554_v42 }
 0x173   : > { %v559_v46 = vsel %vm558_vm2, %v1111_v36, %v555_v43 }
 0x174   : > { %v560_v47 = vmul.f32 %v559_v46, %v548_v44 }
 0x176   : > { %v565_v49 = vmul.f32 %v1104_v45, %v560_v47 }
 0x178   : > { %v570_v50 = vadd.f32 %v1105_v48, %v565_v49 }
 0x17a   : > { %v571_v51 = vpack.c.bf16 %v570_v50, %v570_v50 }
 0x17c   : > { %648 = vmatmul.bf16.vlgmr.msra.gmra.mxu1 %v571_v51 }
 0x1f9   : > { %v649_v55 = vpop.f32.mrf.mxu1 }
 0x1fa   : > { %v650_v56 = vadd.f32 %v1106_v54, %v649_v55 }
 0x1fc   : > { %v653_v57 = vmax.f32 %v650_v56, 0.0 }
 0x1fe   : > { %v654_v58 = vpack.c.bf16 %v653_v57, %v653_v57 }
 0x200   : > { %731 = vmatmul.bf16.vlgmr.msra.gmra.mxu2 %v654_v58 }
 0x201   : > { %v651_v59 = vpop.f32.mrf.mxu1 }
 0x283   : > { %v732_v61 = vpop.f32.mrf.mxu2 }
 0x284   : > { %v733_v62 = vadd.f32 %v1107_v60, %v732_v61 }
 0x286   : > { %v736_v63 = vadd.f32 %v733_v62, %v570_v50 }
 0x288   : > { %737 = vadd.xlane.f32.xlu1 %v736_v63  ;;  %v740_v1 = vmul.f32 %v736_v63, %v736_v63 }
 0x28b   : > { %v734_v0 = vpop.f32.mrf.mxu2 }
 0x290   : > { %741 = vadd.xlane.f32.xlu1 %v740_v1 }
 0x2fb   : > { %v738_v2 = vpop.xlane.xlu1 %737 }
 0x2fc   : > { %v739_v3 = vmul.f32 0.03125, %v738_v2 }
 0x2fe   : > { %v744_v5 = vmul.f32 %v739_v3, %v739_v3  ;;  %v747_v16 = vsub.f32 %v736_v63, %v739_v3 }
 0x303   : > { %v742_v4 = vpop.xlane.xlu1 %741 }
 0x304   : > { %v743_v6 = vmul.f32 0.03125, %v742_v4 }
 0x306   : > { %v745_v7 = vsub.f32 %v743_v6, %v744_v5 }
 0x308   : > { %v746_v8 = vmax.f32 %v745_v7, 0.0 }
 0x30a   : > { %v748_v9 = vadd.f32 1e-05, %v746_v8 }
 0x30c   : > { %1112 = vrsqrt.f32 %v748_v9  ;;  %vm755_vm4 = vweird.f32 %v748_v9 }
 0x312   : > { %v1113_v10 = vpop.eup %1112 }
 0x313   : > { %v750_v11 = vmul.f32 %v1113_v10, %v748_v9  ;;  %vm756_vm3 = vweird.f32 %v1113_v10 }
 0x314   : > { %vm757_vm5 = vmor %vm755_vm4, %vm756_vm3 }
 0x315   : > { %v751_v12 = vmul.f32 %v1113_v10, %v750_v11 }
 0x317   : > { %v752_v13 = vmul.f32 0.5, %v751_v12 }
 0x319   : > { %v753_v14 = vsub.f32 1.5, %v752_v13 }
 0x31b   : > { %v754_v15 = vmul.f32 %v1113_v10, %v753_v14 }
 0x31d   : > { %v758_v18 = vsel %vm757_vm5, %v1113_v10, %v754_v15 }
 0x31e   : > { %v759_v19 = vmul.f32 %v758_v18, %v747_v16 }
 0x320   : > { %v764_v21 = vmul.f32 %v1108_v17, %v759_v19 }
 0x322   : > { %v769_v22 = vadd.f32 %v1109_v20, %v764_v21 }
 0x324   : > { %770 = vst [vmem:[%s453_s24] sm:$0xff] %v769_v22 }
 0x325   : > { %1261 = shalt.err (!%p1258_p9)
}
 0x326   : > { %1038 = dma.vmem_to_hbm [thread:$0]  (%p1451_p13), %s785_s23, 128, %s787_s13, %s772_s28  }
 0x327 PF: > { %s798_s15 = sand.u32 1, %s1296_s17   ;;  %p1583_p10 = scmp.ge.s32.totalorder %s1308_s20, 2 }
 0x328   : > { %s799_s7 = scalar_lea.sflag [#allocation4], %s798_s15 }
 0x329   : > { %p1055_p11 = pnand %p1583_p10, %p1456_p4 }
 0x32b   : > { %p1056_p0 = pneg %p1055_p11 }
 0x32d   : > { %1291 = dma.done.wait (%p1056_p0), %s799_s7, 128  }
 0x32e   : > { %1293 = vsyncadd (%p1056_p0), %s799_s7, 4294967168  ;;  %s1584_s25 = sld [smem:[#allocation15_spill]]  ;;  %p26_p2 = scmp.ge.s32.totalorder %s1431_s14, 4  }
 0x32f   : > { %s1585_s19 = sld [smem:[#allocation16_spill]]  ;;  %s1586_s17 = smov %s1300_s18 }
 0x330   : > { %s1588_s20 = smov %s1431_s14  ;;  %28 = sbr.rel (!%p26_p2) target bundleno = 11 (0xb), region = 121 }
 0x334   : > { %s1587_s18 = smov %s1584_s25 }
 0x335   :  { %805 = vsyncpa [#allocation3], 1 }
 0x336   :  { %807 = vsyncpa [#allocation3 + $0x1], 1 }
 0x337   :  { %808 = vsyncpa [#allocation6], 1 }
 0x338   :  { %809 = vsyncpa [#allocation9], 1 }
 0x339   :  { %810 = vsyncpa [#allocation4], 1 }
 0x33a   :  { %812 = vsyncpa [#allocation4 + $0x1], 1 }

</bundles_post_ra>
